<compile_context>
chip_gen: v7x
topology: tpu7x:2x2x1
jax: 0.10.0
libtpu: 0.0.40
codegen_flags: <defaults>
</compile_context>

<pallas_src>
import functools

import jax
import jax.numpy as jnp
from jax import lax
from jax.experimental import pallas as pl
from jax.experimental.pallas import tpu as pltpu


# --------------------------------------------------------------------------------
# One-time probe of the pltpu.roll rotation convention (and availability).
#   +1 : matches jnp.roll   (out[i] = x[(i - shift) % n])
#   -1 : opposite direction (out[i] = x[(i + shift) % n])
#    0 : native roll unavailable -> use a slice+concat shift instead.
# --------------------------------------------------------------------------------
@functools.lru_cache(maxsize=None)
def _roll_mode():
    def probe(x_ref, o_ref):
        o_ref[...] = pltpu.roll(x_ref[...], shift=1, axis=1)

    try:
        with jax.ensure_compile_time_eval():
            x = jnp.tile(jnp.arange(128, dtype=jnp.float32)[None, :], (8, 1))
            r = pl.pallas_call(
                probe, out_shape=jax.ShapeDtypeStruct((8, 128), jnp.float32))(x)
            return 1 if float(r[0, 0]) > 64.0 else -1
    except Exception:
        return 0


def _vmem_limit_bytes():
    # Per-generation scoped-VMEM knob: ~96 MiB on v5e/v6e (128 MiB physical),
    # ~48 MiB on v7x (64 MiB physical).  Falls back to 48 MiB if the query fails.
    try:
        cap = int(pltpu.get_tpu_info().vmem_capacity_bytes)
    except Exception:
        cap = 64 * 1024 * 1024
    return int(min(96 * 1024 * 1024, cap * 3 // 4))


# --------------------------------------------------------------------------------
# Kernel 1: per-image fused (1x1 res + 3x3 main) conv and dilated 3x3 conv.
# Layout: channels on sublanes, flattened pixels on lanes ("C x HW") -> lane dense.
# Emits pre-BN activations z plus single-pass BN partials (sum, sum of squares).
# --------------------------------------------------------------------------------
def respath_conv_kernel(x_ref, w1_ref, b_ref, w2_ref, m1_ref, m2_ref,
                        z_ref, zsum_ref, zsq_ref,
                        p1_ref, p2_ref, *, W, roll_mode):
    Cin = x_ref.shape[1]
    HW = x_ref.shape[2]
    Cout = w2_ref.shape[0]
    mm = w1_ref.dtype                      # matmul operand dtype (f32 or bf16)

    def shifted(src, off):
        # src[:, (p + off) % HW]  (circular; wrap-around is masked out by the caller)
        o = off % HW
        if o == 0:
            return src
        if roll_mode:                      # native XLU lane rotate
            return pltpu.roll(src, shift=(-off * roll_mode) % HW, axis=1)
        return jnp.concatenate([src[:, o:], src[:, :o]], axis=1)

    def window(src, dh, dw, m_ref, t):
        win = shifted(src, dh * W + dw)
        if dh != 0 or dw != 0:             # zero the conv padding / wrap-around
            win = win * m_ref[t:t + 1, :]
        return win

    xv = x_ref[0]                          # (Cin, HW) f32

    # ---- 3x3 / pad=1 main conv patches (1x1 res conv folded into the centre tap)
    for t in range(9):
        dh, dw = t // 3 - 1, t % 3 - 1
        p1_ref[t * Cin:(t + 1) * Cin, :] = window(xv, dh, dw, m1_ref, t)

    # one matmul, K = 9*Cin, f32 accumulation; merged (res + main) bias
    y = jnp.dot(w1_ref[...], p1_ref[...].astype(mm),
                preferred_element_type=jnp.float32) + b_ref[...]     # (Cout, HW)

    # ---- 3x3 / dilation=3 / pad=3 conv patches (single fused matmul, K = 9*Cout)
    for t in range(9):
        dh, dw = 3 * (t // 3 - 1), 3 * (t % 3 - 1)
        p2_ref[t * Cout:(t + 1) * Cout, :] = window(y, dh, dw, m2_ref, t)

    z = jnp.dot(w2_ref[...], p2_ref[...].astype(mm),
                preferred_element_type=jnp.float32)                  # (Cout, HW)

    # ---- lane-dense pre-BN store + single-pass BN partial statistics
    z_ref[0] = z
    zsum_ref[0] = jnp.sum(z, axis=1, keepdims=True)
    zsq_ref[0] = jnp.sum(z * z, axis=1, keepdims=True)


# --------------------------------------------------------------------------------
# Kernel 2: BatchNorm apply + ReLU, in place on z (lane-dense, unmasked stores).
# --------------------------------------------------------------------------------
def bn_relu_kernel(z_ref, scale_ref, shift_ref, o_ref):
    o_ref[...] = jnp.maximum(z_ref[...] * scale_ref[...] + shift_ref[...], 0.0)


# --------------------------------------------------------------------------------
# Wrapper
# --------------------------------------------------------------------------------
def respath_forward(x_nchw, wr, br, wm, bm, wd, gamma, beta,
                    eps=1e-5, matmul_dtype=jnp.float32):
    """ResPath forward pass.

    x_nchw: (N, Cin, H, W) f32.  wr: (Cout, Cin, 1, 1), wm: (Cout, Cin, 3, 3),
    wd: (Cout, Cout, 3, 3) in PyTorch OIHW layout.  br, bm, gamma, beta: (Cout,).
    Returns (N, Cout, H, W) f32 (training-mode BatchNorm statistics).
    """
    N, Cin, H, W = x_nchw.shape
    Cout = wm.shape[0]
    HW = H * W
    roll_mode = _roll_mode()

    # --- tiny parameter repacking (once per call, in XLA) -----------------------
    # fold the 1x1 res conv into the centre tap of the 3x3 main conv, merge biases
    wm_f = wm.at[:, :, 1, 1].add(wr[:, :, 0, 0])
    w1 = jnp.transpose(wm_f, (0, 2, 3, 1)).reshape(Cout, 9 * Cin).astype(matmul_dtype)
    w2 = jnp.transpose(wd, (0, 2, 3, 1)).reshape(Cout, 9 * Cout).astype(matmul_dtype)
    b1 = (br + bm).reshape(Cout, 1).astype(jnp.float32)

    # per-tap validity masks (== the convs' zero padding), shared by all images
    pix = jnp.arange(HW, dtype=jnp.int32)
    row, col = pix // W, pix % W

    def tap_masks(step):
        ms = []
        for kh in range(3):
            for kw in range(3):
                dh, dw = step * (kh - 1), step * (kw - 1)
                ok = ((row + dh >= 0) & (row + dh < H) &
                      (col + dw >= 0) & (col + dw < W))
                ms.append(ok)
        return jnp.stack(ms).astype(jnp.float32)          # (9, HW)

    m1, m2 = tap_masks(1), tap_masks(3)

    x_flat = x_nchw.reshape(N, Cin, HW)                   # free NCHW -> (N, C, HW)

    cparams = pltpu.CompilerParams(
        dimension_semantics=("parallel",),                # megacore split over batch
        vmem_limit_bytes=_vmem_limit_bytes())

    ce1 = pl.CostEstimate(
        flops=2 * N * HW * (9 * Cin + 9 * Cout) * Cout,
        transcendentals=0,
        bytes_accessed=4 * (N * Cin * HW + N * Cout * HW + 18 * HW
                            + 9 * Cin * Cout + 9 * Cout * Cout + 3 * N * Cout))

    z, zsum, zsq = pl.pallas_call(
        functools.partial(respath_conv_kernel, W=W, roll_mode=roll_mode),
        grid=(N,),
        in_specs=[
            pl.BlockSpec((1, Cin, HW), lambda n: (n, 0, 0)),
            pl.BlockSpec((Cout, 9 * Cin), lambda n: (0, 0)),
            pl.BlockSpec((Cout, 1), lambda n: (0, 0)),
            pl.BlockSpec((Cout, 9 * Cout), lambda n: (0, 0)),
            pl.BlockSpec((9, HW), lambda n: (0, 0)),
            pl.BlockSpec((9, HW), lambda n: (0, 0)),
        ],
        out_specs=(
            pl.BlockSpec((1, Cout, HW), lambda n: (n, 0, 0)),
            pl.BlockSpec((1, Cout, 1), lambda n: (n, 0, 0)),
            pl.BlockSpec((1, Cout, 1), lambda n: (n, 0, 0)),
        ),
        out_shape=(
            jax.ShapeDtypeStruct((N, Cout, HW), jnp.float32),
            jax.ShapeDtypeStruct((N, Cout, 1), jnp.float32),
            jax.ShapeDtypeStruct((N, Cout, 1), jnp.float32),
        ),
        scratch_shapes=[pltpu.VMEM((9 * Cin, HW), jnp.float32),
                        pltpu.VMEM((9 * Cout, HW), jnp.float32)],
        compiler_params=cparams,
        cost_estimate=ce1,
    )(x_flat, w1, b1, w2, m1, m2)

    # --- tiny BatchNorm finalisation from the single-pass partials --------------
    cnt = float(N * H * W)
    mean = jnp.sum(zsum, axis=(0, 2)) / cnt
    var = jnp.maximum(jnp.sum(zsq, axis=(0, 2)) / cnt - mean * mean, 0.0)
    scale = gamma * lax.rsqrt(var + eps)
    shift = beta - mean * scale
    scale_b = scale.reshape(1, Cout, 1).astype(jnp.float32)
    shift_b = shift.reshape(1, Cout, 1).astype(jnp.float32)

    ce2 = pl.CostEstimate(
        flops=3 * N * Cout * HW,
        transcendentals=0,
        bytes_accessed=4 * (2 * N * Cout * HW + 2 * Cout))

    out = pl.pallas_call(
        bn_relu_kernel,
        grid=(N,),
        in_specs=[
            pl.BlockSpec((1, Cout, HW), lambda n: (n, 0, 0)),
            pl.BlockSpec((1, Cout, 1), lambda n: (0, 0, 0)),
            pl.BlockSpec((1, Cout, 1), lambda n: (0, 0, 0)),
        ],
        out_specs=pl.BlockSpec((1, Cout, HW), lambda n: (n, 0, 0)),
        out_shape=jax.ShapeDtypeStruct((N, Cout, HW), jnp.float32),
        input_output_aliases={0: 0},                      # BN+ReLU in place on z
        compiler_params=cparams,
        cost_estimate=ce2,
    )(z, scale_b, shift_b)

    return out.reshape(N, Cout, H, W)


# --------------------------------------------------------------------------------
# Pure-JAX reference matching the PyTorch module (NCHW, training-mode BN).
# --------------------------------------------------------------------------------
def ref_forward_nchw(x, wr, br, wm, bm, wd, gamma, beta, eps=1e-5):
    dn = ("NCHW", "OIHW", "NCHW")
    res = lax.conv_general_dilated(x, wr, (1, 1), "VALID", dimension_numbers=dn)
    res = res + br[None, :, None, None]
    main = lax.conv_general_dilated(x, wm, (1, 1), [(1, 1), (1, 1)],
                                    dimension_numbers=dn)
    main = main + bm[None, :, None, None]
    y = res + main
    z = lax.conv_general_dilated(y, wd, (1, 1), [(3, 3), (3, 3)],
                                 rhs_dilation=(3, 3), dimension_numbers=dn)
    mean = jnp.mean(z, axis=(0, 2, 3), keepdims=True)
    var = jnp.mean((z - mean) ** 2, axis=(0, 2, 3), keepdims=True)
    zn = (z - mean) * lax.rsqrt(var + eps)
    zn = zn * gamma[None, :, None, None] + beta[None, :, None, None]
    return jnp.maximum(zn, 0.0)


if __name__ == "__main__":
    N, Cin, Cout, H, W = 2, 4, 8, 16, 16

    key = jax.random.PRNGKey(0)
    k = jax.random.split(key, 6)
    # deterministic synthetic parameters (PyTorch OIHW layout)
    wr = jax.random.normal(k[0], (Cout, Cin, 1, 1), jnp.float32) * 0.2
    br = jax.random.normal(k[1], (Cout,), jnp.float32) * 0.1
    wm = jax.random.normal(k[2], (Cout, Cin, 3, 3), jnp.float32) * 0.2
    bm = jax.random.normal(k[3], (Cout,), jnp.float32) * 0.1
    wd = jax.random.normal(k[4], (Cout, Cout, 3, 3), jnp.float32) * 0.2
    gamma = jnp.ones((Cout,), jnp.float32)               # BatchNorm2d default init
    beta = jnp.zeros((Cout,), jnp.float32)
    x = jax.random.normal(k[5], (N, Cin, H, W), jnp.float32)

    ref = ref_forward_nchw(x, wr, br, wm, bm, wd, gamma, beta)

    fwd = jax.jit(respath_forward, static_argnames=("matmul_dtype",))

    # f32 MXU operands: tight correctness check
    out = jax.block_until_ready(fwd(x, wr, br, wm, bm, wd, gamma, beta,
                                    matmul_dtype=jnp.float32))
    err = float(jnp.max(jnp.abs(out - ref)))
    assert jnp.allclose(out, ref, atol=3e-4, rtol=3e-4), f"f32 max err {err}"

    # bf16 MXU operands (production fast path): looser tolerance, f32 accumulation
    out_bf16 = jax.block_until_ready(fwd(x, wr, br, wm, bm, wd, gamma, beta,
                                         matmul_dtype=jnp.bfloat16))
    err16 = float(jnp.max(jnp.abs(out_bf16 - ref)))
    assert jnp.allclose(out_bf16, ref, atol=6e-2, rtol=6e-2), f"bf16 max err {err16}"

    print("KERNEL_OK")
</pallas_src>

<mosaic_0001>
module attributes {stable_mosaic.version = 11 : i64} {
  func.func @respath_conv_kernel(%arg0: i32, %arg1: memref<1x4x256xf32, #tpu.memory_space<vmem>>, %arg2: memref<8x36xf32, #tpu.memory_space<vmem>>, %arg3: memref<8x1xf32, #tpu.memory_space<vmem>>, %arg4: memref<8x72xf32, #tpu.memory_space<vmem>>, %arg5: memref<9x256xf32, #tpu.memory_space<vmem>>, %arg6: memref<9x256xf32, #tpu.memory_space<vmem>>, %arg7: memref<1x8x256xf32, #tpu.memory_space<vmem>>, %arg8: memref<1x8x1xf32, #tpu.memory_space<vmem>>, %arg9: memref<1x8x1xf32, #tpu.memory_space<vmem>>, %arg10: memref<36x256xf32, #tpu.memory_space<vmem>>, %arg11: memref<72x256xf32, #tpu.memory_space<vmem>>) attributes {dimension_semantics = [#tpu.dimension_semantics<parallel>], iteration_bounds = array<i64: 2>, scalar_prefetch = 0 : i64, scratch_operands = 2 : i64, tpu.core_type = #tpu.core_type<tc>, window_params = [{transform_indices = @transform_0, window_bounds = array<i64: 1, 4, 256>}, {pipeline_mode = #tpu.pipeline_mode<synchronous>, transform_indices = @transform_1, window_bounds = array<i64: 8, 36>}, {pipeline_mode = #tpu.pipeline_mode<synchronous>, transform_indices = @transform_2, window_bounds = array<i64: 8, 1>}, {pipeline_mode = #tpu.pipeline_mode<synchronous>, transform_indices = @transform_3, window_bounds = array<i64: 8, 72>}, {pipeline_mode = #tpu.pipeline_mode<synchronous>, transform_indices = @transform_4, window_bounds = array<i64: 9, 256>}, {pipeline_mode = #tpu.pipeline_mode<synchronous>, transform_indices = @transform_5, window_bounds = array<i64: 9, 256>}, {transform_indices = @transform_6, window_bounds = array<i64: 1, 8, 256>}, {transform_indices = @transform_7, window_bounds = array<i64: 1, 8, 1>}, {transform_indices = @transform_8, window_bounds = array<i64: 1, 8, 1>}]} {
    %c0 = arith.constant 0 : index
    %c0_0 = arith.constant 0 : index
    %c0_1 = arith.constant 0 : index
    %0 = vector.load %arg1[%c0, %c0_0, %c0_1] : memref<1x4x256xf32, #tpu.memory_space<vmem>>, vector<1x4x256xf32>
    %1 = vector.shape_cast %0 : vector<1x4x256xf32> to vector<4x256xf32>
    %2 = vector.extract_strided_slice %1 {offsets = [0, 239], sizes = [4, 17], strides = [1, 1]} : vector<4x256xf32> to vector<4x17xf32>
    %3 = vector.extract_strided_slice %1 {offsets = [0, 0], sizes = [4, 239], strides = [1, 1]} : vector<4x256xf32> to vector<4x239xf32>
    %4 = tpu.concatenate %2, %3 in 1 : vector<4x17xf32>, vector<4x239xf32> -> vector<4x256xf32>
    %c0_2 = arith.constant 0 : index
    %c0_3 = arith.constant 0 : index
    %5 = vector.load %arg5[%c0_2, %c0_3] : memref<9x256xf32, #tpu.memory_space<vmem>>, vector<1x256xf32>
    %6 = vector.broadcast %5 : vector<1x256xf32> to vector<4x256xf32>
    %7 = arith.mulf %4, %6 : vector<4x256xf32>
    %c0_4 = arith.constant 0 : index
    %c0_5 = arith.constant 0 : index
    %8 = vector.load %arg10[%c0_4, %c0_5] : memref<36x256xf32, #tpu.memory_space<vmem>>, vector<4x256xf32>
    tpu.vector_store %arg10[%c0_4, %c0_5], %7 {strides = array<i32>} : memref<36x256xf32, #tpu.memory_space<vmem>>, vector<4x256xf32>,
    %9 = vector.extract_strided_slice %1 {offsets = [0, 240], sizes = [4, 16], strides = [1, 1]} : vector<4x256xf32> to vector<4x16xf32>
    %10 = vector.extract_strided_slice %1 {offsets = [0, 0], sizes = [4, 240], strides = [1, 1]} : vector<4x256xf32> to vector<4x240xf32>
    %11 = tpu.concatenate %9, %10 in 1 : vector<4x16xf32>, vector<4x240xf32> -> vector<4x256xf32>
    %c1 = arith.constant 1 : index
    %c0_6 = arith.constant 0 : index
    %12 = vector.load %arg5[%c1, %c0_6] : memref<9x256xf32, #tpu.memory_space<vmem>>, vector<1x256xf32>
    %13 = vector.broadcast %12 : vector<1x256xf32> to vector<4x256xf32>
    %14 = arith.mulf %11, %13 : vector<4x256xf32>
    %c4 = arith.constant 4 : index
    %c0_7 = arith.constant 0 : index
    %15 = vector.load %arg10[%c4, %c0_7] : memref<36x256xf32, #tpu.memory_space<vmem>>, vector<4x256xf32>
    tpu.vector_store %arg10[%c4, %c0_7], %14 {strides = array<i32>} : memref<36x256xf32, #tpu.memory_space<vmem>>, vector<4x256xf32>,
    %16 = vector.extract_strided_slice %1 {offsets = [0, 241], sizes = [4, 15], strides = [1, 1]} : vector<4x256xf32> to vector<4x15xf32>
    %17 = vector.extract_strided_slice %1 {offsets = [0, 0], sizes = [4, 241], strides = [1, 1]} : vector<4x256xf32> to vector<4x241xf32>
    %18 = tpu.concatenate %16, %17 in 1 : vector<4x15xf32>, vector<4x241xf32> -> vector<4x256xf32>
    %c2 = arith.constant 2 : index
    %c0_8 = arith.constant 0 : index
    %19 = vector.load %arg5[%c2, %c0_8] : memref<9x256xf32, #tpu.memory_space<vmem>>, vector<1x256xf32>
    %20 = vector.broadcast %19 : vector<1x256xf32> to vector<4x256xf32>
    %21 = arith.mulf %18, %20 : vector<4x256xf32>
    %c8 = arith.constant 8 : index
    %c0_9 = arith.constant 0 : index
    %22 = vector.load %arg10[%c8, %c0_9] : memref<36x256xf32, #tpu.memory_space<vmem>>, vector<4x256xf32>
    tpu.vector_store %arg10[%c8, %c0_9], %21 {strides = array<i32>} : memref<36x256xf32, #tpu.memory_space<vmem>>, vector<4x256xf32>,
    %23 = vector.extract_strided_slice %1 {offsets = [0, 255], sizes = [4, 1], strides = [1, 1]} : vector<4x256xf32> to vector<4x1xf32>
    %24 = vector.extract_strided_slice %1 {offsets = [0, 0], sizes = [4, 255], strides = [1, 1]} : vector<4x256xf32> to vector<4x255xf32>
    %25 = tpu.concatenate %23, %24 in 1 : vector<4x1xf32>, vector<4x255xf32> -> vector<4x256xf32>
    %c3 = arith.constant 3 : index
    %c0_10 = arith.constant 0 : index
    %26 = vector.load %arg5[%c3, %c0_10] : memref<9x256xf32, #tpu.memory_space<vmem>>, vector<1x256xf32>
    %27 = vector.broadcast %26 : vector<1x256xf32> to vector<4x256xf32>
    %28 = arith.mulf %25, %27 : vector<4x256xf32>
    %c12 = arith.constant 12 : index
    %c0_11 = arith.constant 0 : index
    %29 = vector.load %arg10[%c12, %c0_11] : memref<36x256xf32, #tpu.memory_space<vmem>>, vector<4x256xf32>
    tpu.vector_store %arg10[%c12, %c0_11], %28 {strides = array<i32>} : memref<36x256xf32, #tpu.memory_space<vmem>>, vector<4x256xf32>,
    %c16 = arith.constant 16 : index
    %c0_12 = arith.constant 0 : index
    %30 = vector.load %arg10[%c16, %c0_12] : memref<36x256xf32, #tpu.memory_space<vmem>>, vector<4x256xf32>
    tpu.vector_store %arg10[%c16, %c0_12], %1 {strides = array<i32>} : memref<36x256xf32, #tpu.memory_space<vmem>>, vector<4x256xf32>,
    %31 = vector.extract_strided_slice %1 {offsets = [0, 1], sizes = [4, 255], strides = [1, 1]} : vector<4x256xf32> to vector<4x255xf32>
    %32 = vector.extract_strided_slice %1 {offsets = [0, 0], sizes = [4, 1], strides = [1, 1]} : vector<4x256xf32> to vector<4x1xf32>
    %33 = tpu.concatenate %31, %32 in 1 : vector<4x255xf32>, vector<4x1xf32> -> vector<4x256xf32>
    %c5 = arith.constant 5 : index
    %c0_13 = arith.constant 0 : index
    %34 = vector.load %arg5[%c5, %c0_13] : memref<9x256xf32, #tpu.memory_space<vmem>>, vector<1x256xf32>
    %35 = vector.broadcast %34 : vector<1x256xf32> to vector<4x256xf32>
    %36 = arith.mulf %33, %35 : vector<4x256xf32>
    %c20 = arith.constant 20 : index
    %c0_14 = arith.constant 0 : index
    %37 = vector.load %arg10[%c20, %c0_14] : memref<36x256xf32, #tpu.memory_space<vmem>>, vector<4x256xf32>
    tpu.vector_store %arg10[%c20, %c0_14], %36 {strides = array<i32>} : memref<36x256xf32, #tpu.memory_space<vmem>>, vector<4x256xf32>,
    %38 = vector.extract_strided_slice %1 {offsets = [0, 15], sizes = [4, 241], strides = [1, 1]} : vector<4x256xf32> to vector<4x241xf32>
    %39 = vector.extract_strided_slice %1 {offsets = [0, 0], sizes = [4, 15], strides = [1, 1]} : vector<4x256xf32> to vector<4x15xf32>
    %40 = tpu.concatenate %38, %39 in 1 : vector<4x241xf32>, vector<4x15xf32> -> vector<4x256xf32>
    %c6 = arith.constant 6 : index
    %c0_15 = arith.constant 0 : index
    %41 = vector.load %arg5[%c6, %c0_15] : memref<9x256xf32, #tpu.memory_space<vmem>>, vector<1x256xf32>
    %42 = vector.broadcast %41 : vector<1x256xf32> to vector<4x256xf32>
    %43 = arith.mulf %40, %42 : vector<4x256xf32>
    %c24 = arith.constant 24 : index
    %c0_16 = arith.constant 0 : index
    %44 = vector.load %arg10[%c24, %c0_16] : memref<36x256xf32, #tpu.memory_space<vmem>>, vector<4x256xf32>
    tpu.vector_store %arg10[%c24, %c0_16], %43 {strides = array<i32>} : memref<36x256xf32, #tpu.memory_space<vmem>>, vector<4x256xf32>,
    %45 = vector.extract_strided_slice %1 {offsets = [0, 16], sizes = [4, 240], strides = [1, 1]} : vector<4x256xf32> to vector<4x240xf32>
    %46 = vector.extract_strided_slice %1 {offsets = [0, 0], sizes = [4, 16], strides = [1, 1]} : vector<4x256xf32> to vector<4x16xf32>
    %47 = tpu.concatenate %45, %46 in 1 : vector<4x240xf32>, vector<4x16xf32> -> vector<4x256xf32>
    %c7 = arith.constant 7 : index
    %c0_17 = arith.constant 0 : index
    %48 = vector.load %arg5[%c7, %c0_17] : memref<9x256xf32, #tpu.memory_space<vmem>>, vector<1x256xf32>
    %49 = vector.broadcast %48 : vector<1x256xf32> to vector<4x256xf32>
    %50 = arith.mulf %47, %49 : vector<4x256xf32>
    %c28 = arith.constant 28 : index
    %c0_18 = arith.constant 0 : index
    %51 = vector.load %arg10[%c28, %c0_18] : memref<36x256xf32, #tpu.memory_space<vmem>>, vector<4x256xf32>
    tpu.vector_store %arg10[%c28, %c0_18], %50 {strides = array<i32>} : memref<36x256xf32, #tpu.memory_space<vmem>>, vector<4x256xf32>,
    %52 = vector.extract_strided_slice %1 {offsets = [0, 17], sizes = [4, 239], strides = [1, 1]} : vector<4x256xf32> to vector<4x239xf32>
    %53 = vector.extract_strided_slice %1 {offsets = [0, 0], sizes = [4, 17], strides = [1, 1]} : vector<4x256xf32> to vector<4x17xf32>
    %54 = tpu.concatenate %52, %53 in 1 : vector<4x239xf32>, vector<4x17xf32> -> vector<4x256xf32>
    %c8_19 = arith.constant 8 : index
    %c0_20 = arith.constant 0 : index
    %55 = vector.load %arg5[%c8_19, %c0_20] : memref<9x256xf32, #tpu.memory_space<vmem>>, vector<1x256xf32>
    %56 = vector.broadcast %55 : vector<1x256xf32> to vector<4x256xf32>
    %57 = arith.mulf %54, %56 : vector<4x256xf32>
    %c32 = arith.constant 32 : index
    %c0_21 = arith.constant 0 : index
    %58 = vector.load %arg10[%c32, %c0_21] : memref<36x256xf32, #tpu.memory_space<vmem>>, vector<4x256xf32>
    tpu.vector_store %arg10[%c32, %c0_21], %57 {strides = array<i32>} : memref<36x256xf32, #tpu.memory_space<vmem>>, vector<4x256xf32>,
    %c0_22 = arith.constant 0 : index
    %c0_23 = arith.constant 0 : index
    %59 = vector.load %arg2[%c0_22, %c0_23] : memref<8x36xf32, #tpu.memory_space<vmem>>, vector<8x36xf32>
    %c0_24 = arith.constant 0 : index
    %c0_25 = arith.constant 0 : index
    %60 = vector.load %arg10[%c0_24, %c0_25] : memref<36x256xf32, #tpu.memory_space<vmem>>, vector<36x256xf32>
    %cst = arith.constant dense<0.000000e+00> : vector<8x256xf32>
    %61 = tpu.matmul %59, %60, %cst {dimension_numbers = #tpu.dot_dimension_numbers<[1], [0], [0], [1], [0, 0, 1, 1], [], []>} : vector<8x36xf32>, vector<36x256xf32>, vector<8x256xf32> -> vector<8x256xf32>
    %c0_26 = arith.constant 0 : index
    %c0_27 = arith.constant 0 : index
    %62 = vector.load %arg3[%c0_26, %c0_27] : memref<8x1xf32, #tpu.memory_space<vmem>>, vector<8x1xf32>
    %63 = vector.broadcast %62 : vector<8x1xf32> to vector<8x256xf32>
    %64 = arith.addf %61, %63 : vector<8x256xf32>
    %65 = vector.extract_strided_slice %64 {offsets = [0, 205], sizes = [8, 51], strides = [1, 1]} : vector<8x256xf32> to vector<8x51xf32>
    %66 = vector.extract_strided_slice %64 {offsets = [0, 0], sizes = [8, 205], strides = [1, 1]} : vector<8x256xf32> to vector<8x205xf32>
    %67 = tpu.concatenate %65, %66 in 1 : vector<8x51xf32>, vector<8x205xf32> -> vector<8x256xf32>
    %c0_28 = arith.constant 0 : index
    %c0_29 = arith.constant 0 : index
    %68 = vector.load %arg6[%c0_28, %c0_29] : memref<9x256xf32, #tpu.memory_space<vmem>>, vector<1x256xf32>
    %69 = vector.broadcast %68 : vector<1x256xf32> to vector<8x256xf32>
    %70 = arith.mulf %67, %69 : vector<8x256xf32>
    %c0_30 = arith.constant 0 : index
    %c0_31 = arith.constant 0 : index
    %71 = vector.load %arg11[%c0_30, %c0_31] : memref<72x256xf32, #tpu.memory_space<vmem>>, vector<8x256xf32>
    tpu.vector_store %arg11[%c0_30, %c0_31], %70 {strides = array<i32>} : memref<72x256xf32, #tpu.memory_space<vmem>>, vector<8x256xf32>,
    %72 = vector.extract_strided_slice %64 {offsets = [0, 208], sizes = [8, 48], strides = [1, 1]} : vector<8x256xf32> to vector<8x48xf32>
    %73 = vector.extract_strided_slice %64 {offsets = [0, 0], sizes = [8, 208], strides = [1, 1]} : vector<8x256xf32> to vector<8x208xf32>
    %74 = tpu.concatenate %72, %73 in 1 : vector<8x48xf32>, vector<8x208xf32> -> vector<8x256xf32>
    %c1_32 = arith.constant 1 : index
    %c0_33 = arith.constant 0 : index
    %75 = vector.load %arg6[%c1_32, %c0_33] : memref<9x256xf32, #tpu.memory_space<vmem>>, vector<1x256xf32>
    %76 = vector.broadcast %75 : vector<1x256xf32> to vector<8x256xf32>
    %77 = arith.mulf %74, %76 : vector<8x256xf32>
    %c8_34 = arith.constant 8 : index
    %c0_35 = arith.constant 0 : index
    %78 = vector.load %arg11[%c8_34, %c0_35] : memref<72x256xf32, #tpu.memory_space<vmem>>, vector<8x256xf32>
    tpu.vector_store %arg11[%c8_34, %c0_35], %77 {strides = array<i32>} : memref<72x256xf32, #tpu.memory_space<vmem>>, vector<8x256xf32>,
    %79 = vector.extract_strided_slice %64 {offsets = [0, 211], sizes = [8, 45], strides = [1, 1]} : vector<8x256xf32> to vector<8x45xf32>
    %80 = vector.extract_strided_slice %64 {offsets = [0, 0], sizes = [8, 211], strides = [1, 1]} : vector<8x256xf32> to vector<8x211xf32>
    %81 = tpu.concatenate %79, %80 in 1 : vector<8x45xf32>, vector<8x211xf32> -> vector<8x256xf32>
    %c2_36 = arith.constant 2 : index
    %c0_37 = arith.constant 0 : index
    %82 = vector.load %arg6[%c2_36, %c0_37] : memref<9x256xf32, #tpu.memory_space<vmem>>, vector<1x256xf32>
    %83 = vector.broadcast %82 : vector<1x256xf32> to vector<8x256xf32>
    %84 = arith.mulf %81, %83 : vector<8x256xf32>
    %c16_38 = arith.constant 16 : index
    %c0_39 = arith.constant 0 : index
    %85 = vector.load %arg11[%c16_38, %c0_39] : memref<72x256xf32, #tpu.memory_space<vmem>>, vector<8x256xf32>
    tpu.vector_store %arg11[%c16_38, %c0_39], %84 {strides = array<i32>} : memref<72x256xf32, #tpu.memory_space<vmem>>, vector<8x256xf32>,
    %86 = vector.extract_strided_slice %64 {offsets = [0, 253], sizes = [8, 3], strides = [1, 1]} : vector<8x256xf32> to vector<8x3xf32>
    %87 = vector.extract_strided_slice %64 {offsets = [0, 0], sizes = [8, 253], strides = [1, 1]} : vector<8x256xf32> to vector<8x253xf32>
    %88 = tpu.concatenate %86, %87 in 1 : vector<8x3xf32>, vector<8x253xf32> -> vector<8x256xf32>
    %c3_40 = arith.constant 3 : index
    %c0_41 = arith.constant 0 : index
    %89 = vector.load %arg6[%c3_40, %c0_41] : memref<9x256xf32, #tpu.memory_space<vmem>>, vector<1x256xf32>
    %90 = vector.broadcast %89 : vector<1x256xf32> to vector<8x256xf32>
    %91 = arith.mulf %88, %90 : vector<8x256xf32>
    %c24_42 = arith.constant 24 : index
    %c0_43 = arith.constant 0 : index
    %92 = vector.load %arg11[%c24_42, %c0_43] : memref<72x256xf32, #tpu.memory_space<vmem>>, vector<8x256xf32>
    tpu.vector_store %arg11[%c24_42, %c0_43], %91 {strides = array<i32>} : memref<72x256xf32, #tpu.memory_space<vmem>>, vector<8x256xf32>,
    %c32_44 = arith.constant 32 : index
    %c0_45 = arith.constant 0 : index
    %93 = vector.load %arg11[%c32_44, %c0_45] : memref<72x256xf32, #tpu.memory_space<vmem>>, vector<8x256xf32>
    tpu.vector_store %arg11[%c32_44, %c0_45], %64 {strides = array<i32>} : memref<72x256xf32, #tpu.memory_space<vmem>>, vector<8x256xf32>,
    %94 = vector.extract_strided_slice %64 {offsets = [0, 3], sizes = [8, 253], strides = [1, 1]} : vector<8x256xf32> to vector<8x253xf32>
    %95 = vector.extract_strided_slice %64 {offsets = [0, 0], sizes = [8, 3], strides = [1, 1]} : vector<8x256xf32> to vector<8x3xf32>
    %96 = tpu.concatenate %94, %95 in 1 : vector<8x253xf32>, vector<8x3xf32> -> vector<8x256xf32>
    %c5_46 = arith.constant 5 : index
    %c0_47 = arith.constant 0 : index
    %97 = vector.load %arg6[%c5_46, %c0_47] : memref<9x256xf32, #tpu.memory_space<vmem>>, vector<1x256xf32>
    %98 = vector.broadcast %97 : vector<1x256xf32> to vector<8x256xf32>
    %99 = arith.mulf %96, %98 : vector<8x256xf32>
    %c40 = arith.constant 40 : index
    %c0_48 = arith.constant 0 : index
    %100 = vector.load %arg11[%c40, %c0_48] : memref<72x256xf32, #tpu.memory_space<vmem>>, vector<8x256xf32>
    tpu.vector_store %arg11[%c40, %c0_48], %99 {strides = array<i32>} : memref<72x256xf32, #tpu.memory_space<vmem>>, vector<8x256xf32>,
    %101 = vector.extract_strided_slice %64 {offsets = [0, 45], sizes = [8, 211], strides = [1, 1]} : vector<8x256xf32> to vector<8x211xf32>
    %102 = vector.extract_strided_slice %64 {offsets = [0, 0], sizes = [8, 45], strides = [1, 1]} : vector<8x256xf32> to vector<8x45xf32>
    %103 = tpu.concatenate %101, %102 in 1 : vector<8x211xf32>, vector<8x45xf32> -> vector<8x256xf32>
    %c6_49 = arith.constant 6 : index
    %c0_50 = arith.constant 0 : index
    %104 = vector.load %arg6[%c6_49, %c0_50] : memref<9x256xf32, #tpu.memory_space<vmem>>, vector<1x256xf32>
    %105 = vector.broadcast %104 : vector<1x256xf32> to vector<8x256xf32>
    %106 = arith.mulf %103, %105 : vector<8x256xf32>
    %c48 = arith.constant 48 : index
    %c0_51 = arith.constant 0 : index
    %107 = vector.load %arg11[%c48, %c0_51] : memref<72x256xf32, #tpu.memory_space<vmem>>, vector<8x256xf32>
    tpu.vector_store %arg11[%c48, %c0_51], %106 {strides = array<i32>} : memref<72x256xf32, #tpu.memory_space<vmem>>, vector<8x256xf32>,
    %108 = vector.extract_strided_slice %64 {offsets = [0, 48], sizes = [8, 208], strides = [1, 1]} : vector<8x256xf32> to vector<8x208xf32>
    %109 = vector.extract_strided_slice %64 {offsets = [0, 0], sizes = [8, 48], strides = [1, 1]} : vector<8x256xf32> to vector<8x48xf32>
    %110 = tpu.concatenate %108, %109 in 1 : vector<8x208xf32>, vector<8x48xf32> -> vector<8x256xf32>
    %c7_52 = arith.constant 7 : index
    %c0_53 = arith.constant 0 : index
    %111 = vector.load %arg6[%c7_52, %c0_53] : memref<9x256xf32, #tpu.memory_space<vmem>>, vector<1x256xf32>
    %112 = vector.broadcast %111 : vector<1x256xf32> to vector<8x256xf32>
    %113 = arith.mulf %110, %112 : vector<8x256xf32>
    %c56 = arith.constant 56 : index
    %c0_54 = arith.constant 0 : index
    %114 = vector.load %arg11[%c56, %c0_54] : memref<72x256xf32, #tpu.memory_space<vmem>>, vector<8x256xf32>
    tpu.vector_store %arg11[%c56, %c0_54], %113 {strides = array<i32>} : memref<72x256xf32, #tpu.memory_space<vmem>>, vector<8x256xf32>,
    %115 = vector.extract_strided_slice %64 {offsets = [0, 51], sizes = [8, 205], strides = [1, 1]} : vector<8x256xf32> to vector<8x205xf32>
    %116 = vector.extract_strided_slice %64 {offsets = [0, 0], sizes = [8, 51], strides = [1, 1]} : vector<8x256xf32> to vector<8x51xf32>
    %117 = tpu.concatenate %115, %116 in 1 : vector<8x205xf32>, vector<8x51xf32> -> vector<8x256xf32>
    %c8_55 = arith.constant 8 : index
    %c0_56 = arith.constant 0 : index
    %118 = vector.load %arg6[%c8_55, %c0_56] : memref<9x256xf32, #tpu.memory_space<vmem>>, vector<1x256xf32>
    %119 = vector.broadcast %118 : vector<1x256xf32> to vector<8x256xf32>
    %120 = arith.mulf %117, %119 : vector<8x256xf32>
    %c64 = arith.constant 64 : index
    %c0_57 = arith.constant 0 : index
    %121 = vector.load %arg11[%c64, %c0_57] : memref<72x256xf32, #tpu.memory_space<vmem>>, vector<8x256xf32>
    tpu.vector_store %arg11[%c64, %c0_57], %120 {strides = array<i32>} : memref<72x256xf32, #tpu.memory_space<vmem>>, vector<8x256xf32>,
    %c0_58 = arith.constant 0 : index
    %c0_59 = arith.constant 0 : index
    %122 = vector.load %arg4[%c0_58, %c0_59] : memref<8x72xf32, #tpu.memory_space<vmem>>, vector<8x72xf32>
    %c0_60 = arith.constant 0 : index
    %c0_61 = arith.constant 0 : index
    %123 = vector.load %arg11[%c0_60, %c0_61] : memref<72x256xf32, #tpu.memory_space<vmem>>, vector<72x256xf32>
    %cst_62 = arith.constant dense<0.000000e+00> : vector<8x256xf32>
    %124 = tpu.matmul %122, %123, %cst_62 {dimension_numbers = #tpu.dot_dimension_numbers<[1], [0], [0], [1], [0, 0, 1, 1], [], []>} : vector<8x72xf32>, vector<72x256xf32>, vector<8x256xf32> -> vector<8x256xf32>
    %c0_63 = arith.constant 0 : index
    %c0_64 = arith.constant 0 : index
    %c0_65 = arith.constant 0 : index
    %125 = vector.load %arg7[%c0_63, %c0_64, %c0_65] : memref<1x8x256xf32, #tpu.memory_space<vmem>>, vector<1x8x256xf32>
    %126 = vector.shape_cast %125 : vector<1x8x256xf32> to vector<8x256xf32>
    %127 = vector.shape_cast %124 : vector<8x256xf32> to vector<1x8x256xf32>
    tpu.vector_store %arg7[%c0_63, %c0_64, %c0_65], %127 {strides = array<i32>} : memref<1x8x256xf32, #tpu.memory_space<vmem>>, vector<1x8x256xf32>,
    %cst_66 = arith.constant dense<0.000000e+00> : vector<8xf32>
    %128 = vector.multi_reduction <add>, %124, %cst_66 [1] : vector<8x256xf32> to vector<8xf32>
    %129 = vector.shape_cast %128 : vector<8xf32> to vector<8x1xf32>
    %c0_67 = arith.constant 0 : index
    %c0_68 = arith.constant 0 : index
    %c0_69 = arith.constant 0 : index
    %130 = vector.load %arg8[%c0_67, %c0_68, %c0_69] : memref<1x8x1xf32, #tpu.memory_space<vmem>>, vector<1x8x1xf32>
    %131 = vector.shape_cast %130 : vector<1x8x1xf32> to vector<8x1xf32>
    %132 = vector.shape_cast %129 : vector<8x1xf32> to vector<1x8x1xf32>
    tpu.vector_store %arg8[%c0_67, %c0_68, %c0_69], %132 {strides = array<i32>} : memref<1x8x1xf32, #tpu.memory_space<vmem>>, vector<1x8x1xf32>,
    %133 = arith.mulf %124, %124 : vector<8x256xf32>
    %cst_70 = arith.constant dense<0.000000e+00> : vector<8xf32>
    %134 = vector.multi_reduction <add>, %133, %cst_70 [1] : vector<8x256xf32> to vector<8xf32>
    %135 = vector.shape_cast %134 : vector<8xf32> to vector<8x1xf32>
    %c0_71 = arith.constant 0 : index
    %c0_72 = arith.constant 0 : index
    %c0_73 = arith.constant 0 : index
    %136 = vector.load %arg9[%c0_71, %c0_72, %c0_73] : memref<1x8x1xf32, #tpu.memory_space<vmem>>, vector<1x8x1xf32>
    %137 = vector.shape_cast %136 : vector<1x8x1xf32> to vector<8x1xf32>
    %138 = vector.shape_cast %135 : vector<8x1xf32> to vector<1x8x1xf32>
    tpu.vector_store %arg9[%c0_71, %c0_72, %c0_73], %138 {strides = array<i32>} : memref<1x8x1xf32, #tpu.memory_space<vmem>>, vector<1x8x1xf32>,
    return
  }
  func.func @transform_0(%arg0: i32) -> (i32, i32, i32) {
    %c0_i32 = arith.constant 0 : i32
    %c0_i32_0 = arith.constant 0 : i32
    %c0_i32_1 = arith.constant 0 : i32
    return %arg0, %c0_i32, %c0_i32_0 : i32, i32, i32
  }
  func.func @transform_1(%arg0: i32) -> (i32, i32) {
    %c0_i32 = arith.constant 0 : i32
    %c0_i32_0 = arith.constant 0 : i32
    %c0_i32_1 = arith.constant 0 : i32
    return %c0_i32, %c0_i32_0 : i32, i32
  }
  func.func @transform_2(%arg0: i32) -> (i32, i32) {
    %c0_i32 = arith.constant 0 : i32
    %c0_i32_0 = arith.constant 0 : i32
    %c0_i32_1 = arith.constant 0 : i32
    return %c0_i32, %c0_i32_0 : i32, i32
  }
  func.func @transform_3(%arg0: i32) -> (i32, i32) {
    %c0_i32 = arith.constant 0 : i32
    %c0_i32_0 = arith.constant 0 : i32
    %c0_i32_1 = arith.constant 0 : i32
    return %c0_i32, %c0_i32_0 : i32, i32
  }
  func.func @transform_4(%arg0: i32) -> (i32, i32) {
    %c0_i32 = arith.constant 0 : i32
    %c0_i32_0 = arith.constant 0 : i32
    %c0_i32_1 = arith.constant 0 : i32
    return %c0_i32, %c0_i32_0 : i32, i32
  }
  func.func @transform_5(%arg0: i32) -> (i32, i32) {
    %c0_i32 = arith.constant 0 : i32
    %c0_i32_0 = arith.constant 0 : i32
    %c0_i32_1 = arith.constant 0 : i32
    return %c0_i32, %c0_i32_0 : i32, i32
  }
  func.func @transform_6(%arg0: i32) -> (i32, i32, i32) {
    %c0_i32 = arith.constant 0 : i32
    %c0_i32_0 = arith.constant 0 : i32
    %c0_i32_1 = arith.constant 0 : i32
    return %arg0, %c0_i32, %c0_i32_0 : i32, i32, i32
  }
  func.func @transform_7(%arg0: i32) -> (i32, i32, i32) {
    %c0_i32 = arith.constant 0 : i32
    %c0_i32_0 = arith.constant 0 : i32
    %c0_i32_1 = arith.constant 0 : i32
    return %arg0, %c0_i32, %c0_i32_0 : i32, i32, i32
  }
  func.func @transform_8(%arg0: i32) -> (i32, i32, i32) {
    %c0_i32 = arith.constant 0 : i32
    %c0_i32_0 = arith.constant 0 : i32
    %c0_i32_1 = arith.constant 0 : i32
    return %arg0, %c0_i32, %c0_i32_0 : i32, i32, i32
  }
}

module attributes {stable_mosaic.version = 11 : i64} {
  func.func @bn_relu_kernel(%arg0: i32, %arg1: memref<1x8x256xf32, #tpu.memory_space<vmem>>, %arg2: memref<1x8x1xf32, #tpu.memory_space<vmem>>, %arg3: memref<1x8x1xf32, #tpu.memory_space<vmem>>, %arg4: memref<1x8x256xf32, #tpu.memory_space<vmem>>) attributes {dimension_semantics = [#tpu.dimension_semantics<parallel>], iteration_bounds = array<i64: 2>, scalar_prefetch = 0 : i64, scratch_operands = 0 : i64, tpu.core_type = #tpu.core_type<tc>, window_params = [{transform_indices = @transform_0, window_bounds = array<i64: 1, 8, 256>}, {pipeline_mode = #tpu.pipeline_mode<synchronous>, transform_indices = @transform_1, window_bounds = array<i64: 1, 8, 1>}, {pipeline_mode = #tpu.pipeline_mode<synchronous>, transform_indices = @transform_2, window_bounds = array<i64: 1, 8, 1>}, {transform_indices = @transform_3, window_bounds = array<i64: 1, 8, 256>}]} {
    %c0 = arith.constant 0 : index
    %c0_0 = arith.constant 0 : index
    %c0_1 = arith.constant 0 : index
    %0 = vector.load %arg1[%c0, %c0_0, %c0_1] : memref<1x8x256xf32, #tpu.memory_space<vmem>>, vector<1x8x256xf32>
    %c0_2 = arith.constant 0 : index
    %c0_3 = arith.constant 0 : index
    %c0_4 = arith.constant 0 : index
    %1 = vector.load %arg2[%c0_2, %c0_3, %c0_4] : memref<1x8x1xf32, #tpu.memory_space<vmem>>, vector<1x8x1xf32>
    %2 = vector.broadcast %1 : vector<1x8x1xf32> to vector<1x8x256xf32>
    %3 = arith.mulf %0, %2 : vector<1x8x256xf32>
    %c0_5 = arith.constant 0 : index
    %c0_6 = arith.constant 0 : index
    %c0_7 = arith.constant 0 : index
    %4 = vector.load %arg3[%c0_5, %c0_6, %c0_7] : memref<1x8x1xf32, #tpu.memory_space<vmem>>, vector<1x8x1xf32>
    %5 = vector.broadcast %4 : vector<1x8x1xf32> to vector<1x8x256xf32>
    %6 = arith.addf %3, %5 : vector<1x8x256xf32>
    %cst = arith.constant 0.000000e+00 : f32
    %7 = vector.broadcast %cst : f32 to vector<1x8x256xf32>
    %8 = arith.maximumf %6, %7 : vector<1x8x256xf32>
    %c0_8 = arith.constant 0 : index
    %c0_9 = arith.constant 0 : index
    %c0_10 = arith.constant 0 : index
    %9 = vector.load %arg4[%c0_8, %c0_9, %c0_10] : memref<1x8x256xf32, #tpu.memory_space<vmem>>, vector<1x8x256xf32>
    tpu.vector_store %arg4[%c0_8, %c0_9, %c0_10], %8 {strides = array<i32>} : memref<1x8x256xf32, #tpu.memory_space<vmem>>, vector<1x8x256xf32>,
    return
  }
  func.func @transform_0(%arg0: i32) -> (i32, i32, i32) {
    %c0_i32 = arith.constant 0 : i32
    %c0_i32_0 = arith.constant 0 : i32
    %c0_i32_1 = arith.constant 0 : i32
    return %arg0, %c0_i32, %c0_i32_0 : i32, i32, i32
  }
  func.func @transform_1(%arg0: i32) -> (i32, i32, i32) {
    %c0_i32 = arith.constant 0 : i32
    %c0_i32_0 = arith.constant 0 : i32
    %c0_i32_1 = arith.constant 0 : i32
    %c0_i32_2 = arith.constant 0 : i32
    return %c0_i32, %c0_i32_0, %c0_i32_1 : i32, i32, i32
  }
  func.func @transform_2(%arg0: i32) -> (i32, i32, i32) {
    %c0_i32 = arith.constant 0 : i32
    %c0_i32_0 = arith.constant 0 : i32
    %c0_i32_1 = arith.constant 0 : i32
    %c0_i32_2 = arith.constant 0 : i32
    return %c0_i32, %c0_i32_0, %c0_i32_1 : i32, i32, i32
  }
  func.func @transform_3(%arg0: i32) -> (i32, i32, i32) {
    %c0_i32 = arith.constant 0 : i32
    %c0_i32_0 = arith.constant 0 : i32
    %c0_i32_1 = arith.constant 0 : i32
    return %arg0, %c0_i32, %c0_i32_0 : i32, i32, i32
  }
}

</mosaic_0001>

<bundles_post_ra>
// kernel: respath_forward.2
= control target key start
LH: loop header
LB: loop body
LE: loop exit
PB: predicated region body
PF: predicated region fallthrough
CT: control target
= control target key end

     0   :  { %s1269_s27 = smov 0   ;;  %s1434_s0 = inlined_call_operand.vmem [shape: f32[2,4,256], index: 0, kind: input, shape index: {}]   ;;  %s1435_s1 = inlined_call_operand.vmem [shape: f32[8,36], index: 1, kind: input, shape index: {}]   ;;  %s1436_s2 = inlined_call_operand.vmem [shape: f32[8,1], index: 2, kind: input, shape index: {}]   ;;  %s1437_s3 = inlined_call_operand.vmem [shape: f32[8,72], index: 3, kind: input, shape index: {}]   ;;  %s1438_s4 = inlined_call_operand.vmem [shape: f32[9,256], index: 4, kind: input, shape index: {}]   ;;  %s1439_s5 = inlined_call_operand.vmem [shape: f32[9,256], index: 5, kind: input, shape index: {}]   ;;  %s1440_s6 = inlined_call_operand.vmem [shape: f32[2,8,256], index: 6, kind: output, shape index: {0}]   ;;  %s1441_s7 = inlined_call_operand.vmem [shape: f32[2,8,1], index: 7, kind: output, shape index: {1}]   ;;  %s1442_s8 = inlined_call_operand.vmem [shape: f32[2,8,1], index: 8, kind: output, shape index: {2}]  }
   0x1 LB: > { %s1113_s28 = sadd.s32 4294967295, %s1204_s27   ;;  %p1117_p0 = scmp.ge.s32.totalorder %s1204_s27, 1  ;;  %s1204_s27 = sphi %s1269_s27, %s19_s27  }
   0x2   : > { %p267_p1 = scmp.lt.s32.totalorder %s1204_s27, 3 }
   0x4   : > { %p268_p2 = pnand %p1117_p0, %p267_p1 }
   0x5   : > { %p309_p3 = scmp.lt.s32.totalorder (!%p268_p2), %s1113_s28, 1  ;;  %s1206_s11 = smov (!%p268_p2), 1   ;;  %v1214_v2 = vmov (!%p268_p2), 0.0   ;;  %v583_v3 = vld [vmem:[%s1436_s2] sm:$0xff] (!%p268_p2)  ;;  %v1215_v4 = vmov (!%p268_p2), 0   ;;  %v342_v5 = vlaneseq (!%p268_p2)  ;;  %vm361_vm0 = vcmask (!%p268_p2), 130048  }
   0x6   : > { %271 = sbr.rel (%p268_p2) target bundleno = 903 (0x387), region = 44  ;;  %s1207_s12 = smov (!%p268_p2), 16   ;;  %664 = vmatprep.mubr.f32.mxu0 (!%p268_p2), %v1214_v2  ;;  %977 = vmatprep.mubr.f32.mxu1 (!%p268_p2), %v1214_v2  ;;  %v1124_v9 = vld [vmem:[%s1438_s4 + $0x1] ss:$8 sm:$0x3] (!%p268_p2)  ;;  %vm421_vm1 = vcmask (!%p268_p2), 7168  }
   0x7   : > { %s1208_s13 = smov (!%p268_p2), 17   ;;  %s1209_s14 = smov (!%p268_p2), 15   ;;  %1196 = vset.pattern.permute.xlu0 (!%p268_p2), %v1215_v4  ;;  %v343_v6 = vshrl.u32 (!%p268_p2), %v342_v5, 7  ;;  %v1126_v14 = vld [vmem:[%s1438_s4 + $0x3] ss:$8 sm:$0x3] (!%p268_p2) }
   0x8   : > { %s1210_s15 = smov (!%p268_p2), 127   ;;  %s1211_s16 = smov (!%p268_p2), 112   ;;  %v340_v15 = vld [vmem:[%s1438_s4] ss:$8 sm:$0x3] (!%p268_p2)  ;;  %vm335_vm2 = vcmask (!%p268_p2), 138240  }
   0x9   : > { %s1212_s17 = smov (!%p268_p2), 113   ;;  %s1213_s18 = smov (!%p268_p2), 111   ;;  %v1289_v7 = vsub.s32 (!%p268_p2), 0, %v343_v6  ;;  %v1291_v8 = vsub.s32 (!%p268_p2), 1, %v343_v6  ;;  %vm394_vm3 = vcmask (!%p268_p2), 121856   ;;  %vm456_vm4 = vcmask (!%p268_p2), 1039360  }
   0xa   : > { %v1125_v22 = vld [vmem:[%s1438_s4 + $0x2] ss:$8 sm:$0x3] (!%p268_p2)  ;;  %v1127_v41 = vld [vmem:[%s1438_s4 + $0x5] ss:$8 sm:$0x3] (!%p268_p2) }
   0xb   : > { %v372_v12 = vrot.slane (!%p268_p2), %v1124_v9, %v1289_v7  ;;  %v376_v13 = vrot.slane (!%p268_p2), %v1124_v9, %v1291_v8  ;;  %v432_v20 = vrot.slane (!%p268_p2), %v1126_v14, %v1289_v7  ;;  %v436_v21 = vrot.slane (!%p268_p2), %v1126_v14, %v1291_v8  ;;  %v1129_v52 = vld [vmem:[%s1438_s4 + $0x7] ss:$8 sm:$0x3] (!%p268_p2)  ;;  %v1128_v61 = vld [vmem:[%s1438_s4 + $0x6] ss:$8 sm:$0x3] (!%p268_p2) }
   0xc   : > { %v345_v25 = vrot.slane (!%p268_p2), %v340_v15, %v1289_v7  ;;  %v349_v26 = vrot.slane (!%p268_p2), %v340_v15, %v1291_v8  ;;  %v405_v31 = vrot.slane (!%p268_p2), %v1125_v22, %v1289_v7  ;;  %v409_v32 = vrot.slane (!%p268_p2), %v1125_v22, %v1291_v8  ;;  %s1216_s20 = smov (!%p268_p2), 125   ;;  %s1217_s21 = smov (!%p268_p2), 51  }
   0xd   : > { %s1444_s28 = smov (!%p309_p3, %s1113_s28), 1  ;;  %v468_v50 = vrot.slane %v1127_v41, %v1289_v7  ;;  %v472_v51 = vrot.slane %v1127_v41, %v1291_v8  ;;  %vm516_vm5 = vcmask 916480   ;;  %v528_v59 = vrot.slane %v1129_v52, %v1289_v7  ;;  %v572_v41 = vld [vmem:[%s1435_s1] sm:$0xff]  ;;  %s1218_s22 = smov 48  }
   0xe   : > { %s1280_s29 = sshll.u32 %s1444_s28, 3  ;;  %v532_v60 = vrot.slane %v1129_v52, %v1291_v8  ;;  %vm489_vm6 = vcmask 924672   ;;  %v501_v6 = vrot.slane %v1128_v61, %v1289_v7  ;;  %v505_v9 = vrot.slane %v1128_v61, %v1291_v8  ;;  %s1219_s23 = smov 45  }
   0xf   : > { %s313_s10 = scalar_lea.vmem %s1434_s0, %s1280_s29  ;;  %vm549_vm7 = vcmask 908288   ;;  %vm593_vm8 = vcmask 1043456   ;;  %vm589_vm9 = vcmask 293888   ;;  %s1220_s24 = smov 3   ;;  %vm704_vm10 = vcmask 392192  }
  0x10   : > { %v327_v0 = vld [vmem:[%s313_s10] sm:$0xff]  ;;  %s1221_s25 = smov 83   ;;  %s1222_s26 = smov 80   ;;  %vm758_vm11 = vcmask 23552   ;;  %vm731_vm12 = vcmask 367616   ;;  %vm678_vm13 = vcmask 416768  }
  0x11   : > { %419 = vrot.lane.b32.xlu1 %v327_v0, %s1206_s11  ;;  %450 = vst [vmem:[#allocation2 + $0x20] sm:$0xf] %v327_v0  ;;  %359 = vrot.lane.b32.xlu0 %v327_v0, %s1207_s12  ;;  %v329_v1 = vcombine.high %v327_v0, %v327_v0  ;;  %s1223_s30 = smov 77   ;;  %vm786_vm14 = vcmask 1022976   ;;  %vm813_vm15 = vcmask 678912  }
  0x13   : > { %451 = vst [vmem:[#allocation2 + $0x28] sm:$0xf] %v329_v1 }
  0x15   : > { %333 = vrot.lane.b32.xlu1 %v327_v0, %s1208_s13  ;;  %356 = vrot.lane.b32.xlu0 %v329_v1, %s1207_s12 }
  0x19   : > { %416 = vrot.lane.b32.xlu1 %v329_v1, %s1206_s11  ;;  %330 = vrot.lane.b32.xlu0 %v329_v1, %s1208_s13 }
  0x1d   : > { %392 = vrot.lane.b32.xlu1 %v327_v0, %s1209_s14  ;;  %389 = vrot.lane.b32.xlu0 %v329_v1, %s1209_s14  ;;  %s322_s14 = scalar_lea.vmem %s1441_s7, %s1280_s29 }
  0x21   : > { %454 = vrot.lane.b32.xlu1 %v329_v1, %s1210_s15  ;;  %452 = vrot.lane.b32.xlu0 %v327_v0, %s1210_s15 }
  0x25   : > { %514 = vrot.lane.b32.xlu1 %v329_v1, %s1211_s16  ;;  %512 = vrot.lane.b32.xlu0 %v327_v0, %s1211_s16  ;;  %s326_s16 = scalar_lea.vmem %s1442_s8, %s1280_s29 }
  0x29   : > { %487 = vrot.lane.b32.xlu1 %v329_v1, %s1212_s17  ;;  %485 = vrot.lane.b32.xlu0 %v327_v0, %s1212_s17 }
  0x2d   : > { %547 = vrot.lane.b32.xlu1 %v329_v1, %s1213_s18  ;;  %545 = vrot.lane.b32.xlu0 %v327_v0, %s1213_s18 }
  0x31   : > { %586 = vperm.xlu0 %1196, %v583_v3  }
  0x83   : > { %v420_v10 = vpop.permute.xlu1 %419  ;;  %v360_v11 = vpop.permute.xlu0 %359 }
  0x87   : > { %v334_v16 = vpop.permute.xlu1 %333  ;;  %v357_v17 = vpop.permute.xlu0 %356 }
  0x88   : > { %v362_v18 = vsel %vm361_vm0, %v360_v11, %v357_v17  ;;  %v365_v19 = vsel %vm361_vm0, %v357_v17, %v360_v11  ;;  %v1130_v11 = vld [vmem:[%s1438_s4 + $0x10] ss:$8 sm:$0x3]  ;;  %vm840_vm0 = vcmask 654336  }
  0x89   : > { %v379_v23 = vmul.f32 %v372_v12, %v365_v19  ;;  %v380_v24 = vmul.f32 %v376_v13, %v362_v18 }
  0x8b   : > { %v383_v27 = vrot.slane %v379_v23, 4  ;;  %v384_v28 = vrot.slane %v380_v24, 4  ;;  %v417_v29 = vpop.permute.xlu1 %416  ;;  %v331_v30 = vpop.permute.xlu0 %330 }
  0x8c   : > { %v422_v33 = vsel %vm421_vm1, %v420_v10, %v417_v29  ;;  %v425_v34 = vsel %vm421_vm1, %v417_v29, %v420_v10  ;;  %v336_v35 = vsel %vm335_vm2, %v334_v16, %v331_v30  ;;  %v339_v36 = vsel %vm335_vm2, %v331_v30, %v334_v16 }
  0x8d   : > { %387 = vst [vmem:[#allocation2] sm:$0xf0] %v383_v27  ;;  %388 = vst [vmem:[#allocation2 + $0x8] sm:$0xf0] %v384_v28  ;;  %v439_v37 = vmul.f32 %v432_v20, %v425_v34  ;;  %v440_v38 = vmul.f32 %v436_v21, %v422_v33  ;;  %v352_v39 = vmul.f32 %v345_v25, %v339_v36  ;;  %vm867_vm2 = vcmask 629760  }
  0x8e   : > { %v353_v40 = vmul.f32 %v349_v26, %v336_v35  ;;  %v561_v25 = vrot.slane %v1130_v11, %v1289_v7  ;;  %v565_v26 = vrot.slane %v1130_v11, %v1291_v8 }
  0x8f   : > { %v443_v42 = vrot.slane %v439_v37, 4  ;;  %v444_v43 = vrot.slane %v440_v38, 4  ;;  %354 = vst [vmem:[#allocation2] sm:$0xf] %v352_v39  ;;  %v393_v44 = vpop.permute.xlu1 %392  ;;  %v390_v45 = vpop.permute.xlu0 %389 }
  0x90   : > { %355 = vst [vmem:[#allocation2 + $0x8] sm:$0xf] %v353_v40  ;;  %v395_v46 = vsel %vm394_vm3, %v393_v44, %v390_v45  ;;  %v398_v47 = vsel %vm394_vm3, %v390_v45, %v393_v44  ;;  %vm909_vm3 = vcmask 588800  }
  0x91   : > { %447 = vst [vmem:[#allocation2 + $0x10] sm:$0xf0] %v443_v42  ;;  %448 = vst [vmem:[#allocation2 + $0x18] sm:$0xf0] %v444_v43  ;;  %v412_v48 = vmul.f32 %v405_v31, %v398_v47  ;;  %v413_v49 = vmul.f32 %v409_v32, %v395_v46 }
  0x93   : > { %414 = vst [vmem:[#allocation2 + $0x10] sm:$0xf] %v412_v48  ;;  %415 = vst [vmem:[#allocation2 + $0x18] sm:$0xf] %v413_v49  ;;  %v455_v53 = vpop.permute.xlu1 %454  ;;  %v453_v54 = vpop.permute.xlu0 %452 }
  0x94   : > { %v457_v55 = vsel %vm456_vm4, %v453_v54, %v455_v53  ;;  %v461_v56 = vsel %vm456_vm4, %v455_v53, %v453_v54  ;;  %v1134_v53 = vld [vmem:[%s1439_s5 + $0x1] ss:$8 sm:$0x3]  ;;  %v1136_v54 = vld [vmem:[%s1439_s5 + $0x3] ss:$8 sm:$0x3] }
  0x95   : > { %v475_v57 = vmul.f32 %v468_v50, %v457_v55  ;;  %v476_v58 = vmul.f32 %v472_v51, %v461_v56  ;;  %v683_v55 = vld [vmem:[%s1439_s5] ss:$8 sm:$0x3]  ;;  %v715_v56 = vrot.slane %v1134_v53, %v1289_v7  ;;  %v773_v61 = vrot.slane %v1136_v54, %v1291_v8 }
  0x96   : > { %v573_v13 = vld [vmem:[#allocation2] sm:$0xff] }
  0x97   : > { %v479_v62 = vrot.slane %v475_v57, 4  ;;  %v480_v63 = vrot.slane %v476_v58, 4  ;;  %v515_v0 = vpop.permute.xlu1 %514  ;;  %v513_v1 = vpop.permute.xlu0 %512  ;;  %v574_v10 = vld [vmem:[#allocation2 + $0x8] sm:$0xff] }
  0x98   : > { %v517_v2 = vsel %vm516_vm5, %v513_v1, %v515_v0  ;;  %v521_v3 = vsel %vm516_vm5, %v515_v0, %v513_v1  ;;  %v1135_v57 = vld [vmem:[%s1439_s5 + $0x2] ss:$8 sm:$0x3]  ;;  %v688_v1 = vrot.slane %v683_v55, %v1289_v7 }
  0x99   : > { %483 = vst [vmem:[#allocation2 + $0x20] sm:$0xf0] %v479_v62  ;;  %484 = vst [vmem:[#allocation2 + $0x28] sm:$0xf0] %v480_v63  ;;  %v535_v4 = vmul.f32 %v528_v59, %v517_v2  ;;  %v536_v5 = vmul.f32 %v532_v60, %v521_v3  ;;  %v719_v63 = vrot.slane %v1134_v53, %v1291_v8 }
  0x9a   : > { %v576_v12 = vld [vmem:[#allocation2 + $0x18] sm:$0xff]  ;;  %v575_v14 = vld [vmem:[#allocation2 + $0x10] sm:$0xff]  ;;  %v1137_v62 = vld [vmem:[%s1439_s5 + $0x5] ss:$8 sm:$0x3]  ;;  %v692_v2 = vrot.slane %v683_v55, %v1291_v8  ;;  %v746_v3 = vrot.slane %v1135_v57, %v1291_v8 }
  0x9b   : > { %v539_v15 = vrot.slane %v535_v4, 4  ;;  %v540_v16 = vrot.slane %v536_v5, 4  ;;  %v488_v17 = vpop.permute.xlu1 %487  ;;  %v486_v18 = vpop.permute.xlu0 %485  ;;  %v1146_v19 = vpack.c.bf16 %v576_v12, %v574_v10  ;;  %v1148_v20 = vpack.c.bf16 %v575_v14, %v573_v13 }
  0x9c   : > { %v490_v21 = vsel %vm489_vm6, %v486_v18, %v488_v17  ;;  %v494_v22 = vsel %vm489_vm6, %v488_v17, %v486_v18  ;;  %v802_v10 = vrot.slane %v1137_v62, %v1291_v8 }
  0x9d   : > { %543 = vst [vmem:[#allocation2 + $0x30] sm:$0xf0] %v539_v15  ;;  %544 = vst [vmem:[#allocation2 + $0x38] sm:$0xf0] %v540_v16  ;;  %v508_v23 = vmul.f32 %v501_v6, %v490_v21  ;;  %v509_v24 = vmul.f32 %v505_v9, %v494_v22  ;;  %1147 = vmatprep.subr.bf16.mxu0 %v1146_v19  ;;  %v769_v6 = vrot.slane %v1136_v54, %v1289_v7 }
  0x9e   : > { %1149 = vmatpush1.bf16.msra.mxu0 %v1148_v20  ;;  %v742_v19 = vrot.slane %v1135_v57, %v1289_v7 }
  0x9f   : > { %510 = vst [vmem:[#allocation2 + $0x30] sm:$0xf] %v508_v23  ;;  %511 = vst [vmem:[#allocation2 + $0x38] sm:$0xf] %v509_v24  ;;  %v548_v27 = vpop.permute.xlu1 %547  ;;  %v546_v28 = vpop.permute.xlu0 %545 }
  0xa0   : > { %v550_v29 = vsel %vm549_vm7, %v546_v28, %v548_v27  ;;  %v554_v30 = vsel %vm549_vm7, %v548_v27, %v546_v28  ;;  %v578_v33 = vld [vmem:[#allocation2 + $0x28] sm:$0xff]  ;;  %v577_v35 = vld [vmem:[#allocation2 + $0x20] sm:$0xff]  ;;  %v798_v27 = vrot.slane %v1137_v62, %v1289_v7 }
  0xa1   : > { %v568_v31 = vmul.f32 %v561_v25, %v550_v29  ;;  %v569_v32 = vmul.f32 %v565_v26, %v554_v30 }
  0xa3   : > { %570 = vst [vmem:[#allocation2 + $0x40] sm:$0xf] %v568_v31  ;;  %571 = vst [vmem:[#allocation2 + $0x48] sm:$0xf] %v569_v32 }
  0xa4   : > { %v1138_v32 = vld [vmem:[%s1439_s5 + $0x6] ss:$8 sm:$0x3] }
  0xa6   : > { %v580_v34 = vld [vmem:[#allocation2 + $0x38] sm:$0xff]  ;;  %v579_v36 = vld [vmem:[#allocation2 + $0x30] sm:$0xff] }
  0xa7   : > { %v1150_v37 = vpack.c.bf16 %v580_v34, %v578_v33  ;;  %v1152_v38 = vpack.c.bf16 %v579_v36, %v577_v35  ;;  %v1139_v34 = vld [vmem:[%s1439_s5 + $0x7] ss:$8 sm:$0x3] }
  0xa9   : > { %1151 = vmatprep.subr.bf16.mxu0 %v1150_v37  ;;  %v825_v37 = vrot.slane %v1138_v32, %v1289_v7 }
  0xaa   : > { %1153 = vmatpush1.bf16.msra.mxu0 %v1152_v38  ;;  %v582_v39 = vld [vmem:[#allocation2 + $0x48] sm:$0xf]  ;;  %v581_v40 = vld [vmem:[#allocation2 + $0x40] sm:$0xf]  ;;  %v829_v38 = vrot.slane %v1138_v32, %v1291_v8 }
  0xab   : > { %1131 = vmatprep.subr.msk.mxu0 %vm593_vm8, %v582_v39 }
  0xae   : > { %1132 = vmatpush1.msk.msra.mxu0 %vm593_vm8, %v581_v40 }
  0xaf   : > { %1133 = vmatmul.mubr.msk.f32.vlgmr.msra.gmra.mrb[0].mxu0 %vm589_vm9, %v572_v41 }
  0xb0   : > { %v587_v42 = vpop.permute.xlu0 %586 }
 0x182   : > { %v666_v43 = vpop.f32.mrb[0].mxu0 }
 0x183   : > { %v1344_v44 = vadd.f32 %v666_v43, %v587_v42  ;;  %v668_v45 = vpop.f32.mrb[1].mxu0  ;;  %v856_v43 = vrot.slane %v1139_v34, %v1291_v8 }
 0x184   : > { %v1348_v46 = vadd.f32 %v668_v45, %v587_v42  ;;  %v852_v42 = vrot.slane %v1139_v34, %v1289_v7  ;;  %v1140_v45 = vld [vmem:[%s1439_s5 + $0x10] ss:$8 sm:$0x3] }
 0x185   : > { %782 = vrot.lane.b32.xlu0 %v1344_v44, %s1216_s20  ;;  %676 = vrot.lane.b32.xlu1 %v1344_v44, %s1217_s21 }
 0x189   : > { %699 = vrot.lane.b32.xlu0 %v1348_v46, %s1218_s22  ;;  %702 = vrot.lane.b32.xlu1 %v1344_v44, %s1218_s22 }
 0x18d   : > { %726 = vrot.lane.b32.xlu0 %v1348_v46, %s1219_s23  ;;  %729 = vrot.lane.b32.xlu1 %v1344_v44, %s1219_s23 }
 0x191   : > { %753 = vrot.lane.b32.xlu0 %v1348_v46, %s1220_s24  ;;  %756 = vrot.lane.b32.xlu1 %v1344_v44, %s1220_s24 }
 0x195   : > { %809 = vrot.lane.b32.xlu0 %v1344_v44, %s1221_s25  ;;  %672 = vrot.lane.b32.xlu1 %v1348_v46, %s1217_s21 }
 0x199   : > { %836 = vrot.lane.b32.xlu0 %v1344_v44, %s1222_s26  ;;  %784 = vrot.lane.b32.xlu1 %v1348_v46, %s1216_s20 }
 0x19d   : > { %863 = vrot.lane.b32.xlu0 %v1344_v44, %s1223_s30  ;;  %811 = vrot.lane.b32.xlu1 %v1348_v46, %s1221_s25 }
 0x1a1   : > { %838 = vrot.lane.b32.xlu1 %v1348_v46, %s1222_s26 }
 0x1a5   : > { %865 = vrot.lane.b32.xlu1 %v1348_v46, %s1223_s30  ;;  %s1145_s30 = sshll.u32 %s1444_s28, 4 }
 0x1a6   : > { %s318_s11 = scalar_lea.vmem %s1440_s6, %s1145_s30 }
 0x1f7   : > { %v783_v47 = vpop.permute.xlu0 %782  ;;  %v677_v48 = vpop.permute.xlu1 %676 }
 0x1fb   : > { %v700_v49 = vpop.permute.xlu0 %699  ;;  %v703_v50 = vpop.permute.xlu1 %702 }
 0x1fc   : > { %v708_v60 = vsel %vm704_vm10, %v700_v49, %v703_v50  ;;  %v705_v0 = vsel %vm704_vm10, %v703_v50, %v700_v49 }
 0x1fd   : > { %v722_v5 = vmul.f32 %v715_v56, %v708_v60  ;;  %v723_v14 = vmul.f32 %v719_v63, %v705_v0 }
 0x1ff   : > { %v727_v51 = vpop.permute.xlu0 %726  ;;  %v730_v52 = vpop.permute.xlu1 %729 }
 0x200   : > { %v732_v11 = vsel %vm731_vm12, %v730_v52, %v727_v51  ;;  %v735_v20 = vsel %vm731_vm12, %v727_v51, %v730_v52 }
 0x201   : > { %v750_v21 = vmul.f32 %v746_v3, %v732_v11  ;;  %v749_v33 = vmul.f32 %v742_v19, %v735_v20 }
 0x203   : > { %v754_v58 = vpop.permute.xlu0 %753  ;;  %v757_v59 = vpop.permute.xlu1 %756 }
 0x204   : > { %v759_v4 = vsel %vm758_vm11, %v757_v59, %v754_v58  ;;  %v762_v15 = vsel %vm758_vm11, %v754_v58, %v757_v59 }
 0x205   : > { %v777_v16 = vmul.f32 %v773_v61, %v759_v4  ;;  %v776_v26 = vmul.f32 %v769_v6, %v762_v15  ;;  %v879_v61 = vrot.slane %v1140_v45, %v1289_v7 }
 0x207   : > { %v673_v9 = vpop.permute.xlu1 %672  ;;  %v810_v22 = vpop.permute.xlu0 %809  ;;  %v1158_v31 = vpack.c.bf16 %v777_v16, %v750_v21  ;;  %v1160_v39 = vpack.c.bf16 %v776_v26, %v749_v33 }
 0x208   : > { %v679_v12 = vsel %vm678_vm13, %v677_v48, %v673_v9  ;;  %v682_v13 = vsel %vm678_vm13, %v673_v9, %v677_v48 }
 0x209   : > { %v695_v17 = vmul.f32 %v688_v1, %v682_v13  ;;  %v696_v18 = vmul.f32 %v692_v2, %v679_v12 }
 0x20b   : > { %v785_v23 = vpop.permute.xlu1 %784  ;;  %v1154_v24 = vpack.c.bf16 %v723_v14, %v696_v18  ;;  %v1156_v25 = vpack.c.bf16 %v722_v5, %v695_v17  ;;  %v837_v40 = vpop.permute.xlu0 %836 }
 0x20c   : > { %v791_v28 = vsel %vm786_vm14, %v785_v23, %v783_v47  ;;  %v787_v29 = vsel %vm786_vm14, %v783_v47, %v785_v23 }
 0x20d   : > { %v806_v30 = vmul.f32 %v802_v10, %v791_v28  ;;  %1155 = vmatprep.subr.bf16.mxu1 %v1154_v24  ;;  %v805_v36 = vmul.f32 %v798_v27, %v787_v29 }
 0x20e   : > { %1157 = vmatpush1.bf16.msra.mxu1 %v1156_v25 }
 0x20f   : > { %1159 = vmatprep.subr.bf16.mxu1 %v1158_v31  ;;  %v812_v35 = vpop.permute.xlu1 %811  ;;  %v1162_v41 = vpack.c.bf16 %v806_v30, %v1348_v46  ;;  %v1164_v52 = vpack.c.bf16 %v805_v36, %v1344_v44  ;;  %v883_v46 = vrot.slane %v1140_v45, %v1291_v8  ;;  %v864_v57 = vpop.permute.xlu0 %863  ;;  %v890_v44 = vld [vmem:[%s1437_s3] sm:$0xff] }
 0x210   : > { %v814_v47 = vsel %vm813_vm15, %v810_v22, %v812_v35  ;;  %v818_v48 = vsel %vm813_vm15, %v812_v35, %v810_v22 }
 0x211   : > { %v832_v53 = vmul.f32 %v825_v37, %v814_v47  ;;  %v833_v54 = vmul.f32 %v829_v38, %v818_v48 }
 0x212   : > { %1161 = vmatpush1.bf16.msra.mxu1 %v1160_v39 }
 0x213   : > { %1163 = vmatprep.subr.bf16.mxu1 %v1162_v41  ;;  %v839_v49 = vpop.permute.xlu1 %838 }
 0x214   : > { %v841_v50 = vsel %vm840_vm0, %v837_v40, %v839_v49  ;;  %v845_v51 = vsel %vm840_vm0, %v839_v49, %v837_v40 }
 0x215   : > { %v859_v55 = vmul.f32 %v852_v42, %v841_v50  ;;  %v860_v56 = vmul.f32 %v856_v43, %v845_v51 }
 0x216   : > { %1165 = vmatpush1.bf16.msra.mxu1 %v1164_v52 }
 0x217   : > { %v866_v58 = vpop.permute.xlu1 %865  ;;  %v1166_v59 = vpack.c.bf16 %v860_v56, %v833_v54  ;;  %v1168_v60 = vpack.c.bf16 %v859_v55, %v832_v53 }
 0x218   : > { %v872_v62 = vsel %vm867_vm2, %v866_v58, %v864_v57  ;;  %v868_v63 = vsel %vm867_vm2, %v864_v57, %v866_v58 }
 0x219   : > { %v887_v0 = vmul.f32 %v883_v46, %v872_v62  ;;  %1167 = vmatprep.subr.bf16.mxu1 %v1166_v59  ;;  %v886_v8 = vmul.f32 %v879_v61, %v868_v63 }
 0x21a   : > { %1169 = vmatpush1.bf16.msra.mxu1 %v1168_v60 }
 0x21b   : > { %929 = vmatprep.subr.mxu1 %v887_v0 }
 0x21e   : > { %930 = vmatpush1.msra.mxu1 %v886_v8 }
 0x21f   : > { %1141 = vmatmul.mubr.msk.f32.vlgmr.msra.gmra.mrb[0].mxu1 %vm909_vm3, %v890_v44 }
 0x2f2   : > { %v979_v7 = vpop.f32.mrb[0].mxu1 }
 0x2f3   : > { %v981_v1 = vpop.f32.mrb[1].mxu1  ;;  %984 = vst [vmem:[%s318_s11] sm:$0xff] %v979_v7  ;;  %v990_v2 = vmul.f32 %v979_v7, %v979_v7 }
 0x2f4   : > { %985 = vst [vmem:[%s318_s11 + $0x8] sm:$0xff] %v981_v1  ;;  %v991_v3 = vmul.f32 %v981_v1, %v981_v1  ;;  %v986_v4 = vadd.f32 %v981_v1, %v979_v7 }
 0x2f6   : > { %987 = vadd.xlane.f32.xlu0 %v986_v4  ;;  %v992_v5 = vadd.f32 %v991_v3, %v990_v2 }
 0x2f8   : > { %993 = vadd.xlane.f32.xlu1 %v992_v5 }
 0x383   : > { %v988_v6 = vpop.xlane.xlu0 %987 }
 0x384   : > { %989 = vst.msk [vmem:[%s322_s14] sm:$0xff] %vm421_vm1, %v988_v6 }
 0x385   : > { %v994_v9 = vpop.xlane.xlu1 %993 }
 0x386   : > { %995 = vst.msk [vmem:[%s326_s16] sm:$0xff] %vm421_vm1, %v994_v9 }
 0x387 PF: > { %s19_s27 = sadd.s32 1, %s1204_s27  }
 0x388   : > { %p16_p4 = scmp.ge.s32.totalorder %s19_s27, 4  }
 0x38a   :  { %18 = sbr.rel (!%p16_p4) target bundleno = 1 (0x1), region = 112 }

// kernel: respath_forward.3
= control target key start
LH: loop header
LB: loop body
LE: loop exit
PB: predicated region body
PF: predicated region fallthrough
CT: control target
= control target key end

     0   :  { %s300_s12 = smov 0   ;;  %s323_s0 = inlined_call_operand.vmem [shape: f32[2,8,256], index: 0, kind: input, shape index: {}, may-alias: {0,3}]   ;;  %s324_s1 = inlined_call_operand.vmem [shape: f32[1,8,1], index: 1, kind: input, shape index: {}]   ;;  %s325_s2 = inlined_call_operand.vmem [shape: f32[1,8,1], index: 2, kind: input, shape index: {}]   ;;  %s326_s3 = inlined_call_operand.vmem [shape: f32[2,8,256], index: 3, kind: output, shape index: {}, may-alias: {0,3}]  }
   0x1 LB: > { %s248_s13 = sadd.s32 4294967295, %s277_s12   ;;  %p252_p0 = scmp.ge.s32.totalorder %s277_s12, 1  ;;  %s277_s12 = sphi %s300_s12, %s13_s12  }
   0x2   : > { %p137_p1 = scmp.lt.s32.totalorder %s277_s12, 3 }
   0x4   : > { %p138_p2 = pnand %p252_p0, %p137_p1 }
   0x5   : > { %v173_v0 = vld [vmem:[%s324_s1] sm:$0xff] (!%p138_p2)  ;;  %v279_v1 = vmov (!%p138_p2), 0   ;;  %p161_p3 = scmp.lt.s32.totalorder (!%p138_p2), %s248_s13, 1 }
   0x6   : > { %141 = sbr.rel (%p138_p2) target bundleno = 144 (0x90), region = 32  ;;  %270 = vset.pattern.permute.xlu0 (!%p138_p2), %v279_v1  ;;  %v181_v2 = vld [vmem:[%s325_s2] sm:$0xff] (!%p138_p2) }
   0x7   : > { %176 = vperm.xlu0 (!%p138_p2), %270, %v173_v0  }
   0xb   : > { %184 = vperm.xlu0 (!%p138_p2), %270, %v181_v2  }
   0xd   : > { %s328_s13 = smov (!%p161_p3, %s248_s13), 1 }
   0xe   : > { %s259_s18 = sshll.u32 %s328_s13, 4 }
   0xf   : > { %s165_s21 = scalar_lea.vmem %s323_s0, %s259_s18  ;;  %s170_s24 = scalar_lea.vmem %s326_s3, %s259_s18 }
  0x10   : > { %v171_v4 = vld [vmem:[%s165_s21] sm:$0xff]  ;;  %v172_v5 = vld [vmem:[%s165_s21 + $0x8] sm:$0xff] }
  0x86   : > { %v177_v3 = vpop.permute.xlu0 %176 }
  0x87   : > { %v179_v6 = vmul.f32 %v177_v3, %v171_v4  ;;  %v180_v7 = vmul.f32 %v177_v3, %v172_v5 }
  0x8a   : > { %v185_v8 = vpop.permute.xlu0 %184 }
  0x8b   : > { %v187_v9 = vadd.f32 %v185_v8, %v179_v6  ;;  %v188_v10 = vadd.f32 %v185_v8, %v180_v7 }
  0x8d   : > { %v189_v11 = vmax.f32 %v187_v9, 0.0  ;;  %v190_v12 = vmax.f32 %v188_v10, 0.0 }
  0x8f   : > { %191 = vst [vmem:[%s170_s24] sm:$0xff] %v189_v11  ;;  %192 = vst [vmem:[%s170_s24 + $0x8] sm:$0xff] %v190_v12 }
  0x90 PF: > { %s13_s12 = sadd.s32 1, %s277_s12  }
  0x91   : > { %p10_p4 = scmp.ge.s32.totalorder %s13_s12, 4  }
  0x93   :  { %12 = sbr.rel (!%p10_p4) target bundleno = 1 (0x1), region = 62 }

</bundles_post_ra>
